<compile_context>
chip_gen: v6e
topology: v6e:2x2x1
jax: 0.10.0
libtpu: 0.0.40
codegen_flags: <defaults>
</compile_context>

<pallas_src>
import math

import jax
import jax.numpy as jnp
from jax import lax
from jax.experimental import pallas as pl
from jax.experimental.pallas import tpu as pltpu


def mhn_similarity_kernel(q_ref, w_ref, k_ref, out_ref, qw_ref):
    m = pl.program_id(1)

    # Hoisted once per batch element: qW = query @ W   (B, key_dim)
    @pl.when(m == 0)
    def _():
        qw_ref[...] = jnp.dot(
            q_ref[0],
            w_ref[...],
            preferred_element_type=jnp.float32,
            precision=lax.Precision.HIGHEST,
        )

    # sim_tile = qW @ keys_tile^T without materializing the transpose:
    # contract key_dim (axis 1 of both operands).
    sim = lax.dot_general(
        qw_ref[...],
        k_ref[0],
        dimension_numbers=(((1,), (1,)), ((), ())),
        preferred_element_type=jnp.float32,
        precision=lax.Precision.HIGHEST,
    )  # (B, tile_m)

    out_ref[0] = sim.astype(out_ref.dtype)


def mhn_similarity(query, weight, keys, *, tile_m=512):
    """query: (..., B, Dq)  weight: (Dq, Dk)  keys: (..., M, Dk)  ->  (..., B, M)"""
    batch_dims = query.shape[:-2]
    assert keys.shape[:-2] == batch_dims, "query/keys leading batch dims must match"
    B, Dq = query.shape[-2:]
    M, Dk = keys.shape[-2:]
    assert weight.shape == (Dq, Dk)

    N = math.prod(batch_dims) if batch_dims else 1
    q3 = query.reshape(N, B, Dq)
    k3 = keys.reshape(N, M, Dk)

    # Tile-size normalization: tile_m must divide M and be lane-aligned (x128)
    # unless it covers the whole memory axis.
    if tile_m > M:
        tile_m = M
    if (M % tile_m != 0) or (tile_m != M and tile_m % 128 != 0):
        tile_m = M

    grid = (N, M // tile_m)

    out = pl.pallas_call(
        mhn_similarity_kernel,
        out_shape=jax.ShapeDtypeStruct((N, B, M), jnp.float32),
        grid_spec=pltpu.PrefetchScalarGridSpec(
            num_scalar_prefetch=0,
            grid=grid,
            in_specs=[
                # query: one batch element, reused across all m-tiles
                pl.BlockSpec((1, B, Dq), lambda n, m: (n, 0, 0)),
                # weight: whole matrix, resident across the grid
                pl.BlockSpec((Dq, Dk), lambda n, m: (0, 0)),
                # keys: streamed over the memory axis
                pl.BlockSpec((1, tile_m, Dk), lambda n, m: (n, m, 0)),
            ],
            out_specs=pl.BlockSpec((1, B, tile_m), lambda n, m: (n, 0, m)),
            scratch_shapes=[pltpu.VMEM((B, Dk), jnp.float32)],  # qW
        ),
        compiler_params=pltpu.CompilerParams(
            dimension_semantics=("parallel", "arbitrary"),
        ),
    )(q3, weight, k3)

    return out.reshape(*batch_dims, B, M)


def reference_forward(query, weight, keys):
    return jnp.einsum(
        "...ij,jk,...lk->...il",
        query,
        weight,
        keys,
        precision=lax.Precision.HIGHEST,
    )


if __name__ == "__main__":
    # Small but lane-aligned shapes consistent with the module.
    N = 2            # leading batch ('...')
    B = 8            # rows of query
    query_dim = 128
    key_dim = 128
    M = 512          # number of keys (memory slots)

    key = jax.random.PRNGKey(0)
    k_q, k_k, k_w = jax.random.split(key, 3)

    query = jax.random.normal(k_q, (N, B, query_dim), dtype=jnp.float32)
    keys = jax.random.normal(k_k, (N, M, key_dim), dtype=jnp.float32)

    # kaiming_uniform_(a=sqrt(5)) on (query_dim, key_dim): bound = 1/sqrt(fan_in),
    # fan_in = key_dim for a PyTorch 2-D parameter.
    bound = 1.0 / (key_dim ** 0.5)
    weight = jax.random.uniform(
        k_w, (query_dim, key_dim), minval=-bound, maxval=bound, dtype=jnp.float32
    )

    out = mhn_similarity(query, weight, keys, tile_m=128)
    out = jax.block_until_ready(out)

    ref = reference_forward(query, weight, keys)
    assert out.shape == (N, B, M)
    assert jnp.allclose(out, ref, atol=1e-3, rtol=1e-3), "kernel mismatch vs reference"

    print("KERNEL_OK")
</pallas_src>

<mosaic_0001>
module attributes {stable_mosaic.version = 11 : i64} {
  func.func @mhn_similarity_kernel(%arg0: i32, %arg1: i32, %arg2: memref<1x8x128xf32, #tpu.memory_space<vmem>>, %arg3: memref<128x128xf32, #tpu.memory_space<vmem>>, %arg4: memref<1x128x128xf32, #tpu.memory_space<vmem>>, %arg5: memref<1x8x128xf32, #tpu.memory_space<vmem>>, %arg6: memref<8x128xf32, #tpu.memory_space<vmem>>) attributes {dimension_semantics = [#tpu.dimension_semantics<parallel>, #tpu.dimension_semantics<arbitrary>], iteration_bounds = array<i64: 2, 4>, scalar_prefetch = 0 : i64, scratch_operands = 1 : i64, tpu.core_type = #tpu.core_type<tc>, window_params = [{transform_indices = @transform_0, window_bounds = array<i64: 1, 8, 128>}, {pipeline_mode = #tpu.pipeline_mode<synchronous>, transform_indices = @transform_1, window_bounds = array<i64: 128, 128>}, {transform_indices = @transform_2, window_bounds = array<i64: 1, 128, 128>}, {transform_indices = @transform_3, window_bounds = array<i64: 1, 8, 128>}]} {
    %c0_i32 = arith.constant 0 : i32
    %0 = arith.cmpi eq, %arg1, %c0_i32 : i32
    %1 = arith.extui %0 : i1 to i32
    %c0_i32_0 = arith.constant 0 : i32
    %2 = arith.cmpi ne, %1, %c0_i32_0 : i32
    scf.if %2 {
      %c0_8 = arith.constant 0 : index
      %c0_9 = arith.constant 0 : index
      %c0_10 = arith.constant 0 : index
      %10 = vector.load %arg2[%c0_8, %c0_9, %c0_10] : memref<1x8x128xf32, #tpu.memory_space<vmem>>, vector<1x8x128xf32>
      %11 = vector.shape_cast %10 : vector<1x8x128xf32> to vector<8x128xf32>
      %c0_11 = arith.constant 0 : index
      %c0_12 = arith.constant 0 : index
      %12 = vector.load %arg3[%c0_11, %c0_12] : memref<128x128xf32, #tpu.memory_space<vmem>>, vector<128x128xf32>
      %cst_13 = arith.constant dense<0.000000e+00> : vector<8x128xf32>
      %13 = tpu.matmul %11, %12, %cst_13 {dimension_numbers = #tpu.dot_dimension_numbers<[1], [0], [0], [1], [0, 0, 1, 1], [], []>, precision = #tpu.contract_precision<fp32>} : vector<8x128xf32>, vector<128x128xf32>, vector<8x128xf32> -> vector<8x128xf32>
      %c0_14 = arith.constant 0 : index
      %c0_15 = arith.constant 0 : index
      %14 = vector.load %arg6[%c0_14, %c0_15] : memref<8x128xf32, #tpu.memory_space<vmem>>, vector<8x128xf32>
      tpu.vector_store %arg6[%c0_14, %c0_15], %13 {strides = array<i32>} : memref<8x128xf32, #tpu.memory_space<vmem>>, vector<8x128xf32>,
    } else {
    }
    %c0 = arith.constant 0 : index
    %c0_1 = arith.constant 0 : index
    %3 = vector.load %arg6[%c0, %c0_1] : memref<8x128xf32, #tpu.memory_space<vmem>>, vector<8x128xf32>
    %c0_2 = arith.constant 0 : index
    %c0_3 = arith.constant 0 : index
    %c0_4 = arith.constant 0 : index
    %4 = vector.load %arg4[%c0_2, %c0_3, %c0_4] : memref<1x128x128xf32, #tpu.memory_space<vmem>>, vector<1x128x128xf32>
    %5 = vector.shape_cast %4 : vector<1x128x128xf32> to vector<128x128xf32>
    %cst = arith.constant dense<0.000000e+00> : vector<8x128xf32>
    %6 = tpu.matmul %3, %5, %cst {dimension_numbers = #tpu.dot_dimension_numbers<[1], [1], [0], [0], [0, 0, 1, 0], [], []>, precision = #tpu.contract_precision<fp32>} : vector<8x128xf32>, vector<128x128xf32>, vector<8x128xf32> -> vector<8x128xf32>
    %c0_5 = arith.constant 0 : index
    %c0_6 = arith.constant 0 : index
    %c0_7 = arith.constant 0 : index
    %7 = vector.load %arg5[%c0_5, %c0_6, %c0_7] : memref<1x8x128xf32, #tpu.memory_space<vmem>>, vector<1x8x128xf32>
    %8 = vector.shape_cast %7 : vector<1x8x128xf32> to vector<8x128xf32>
    %9 = vector.shape_cast %6 : vector<8x128xf32> to vector<1x8x128xf32>
    tpu.vector_store %arg5[%c0_5, %c0_6, %c0_7], %9 {strides = array<i32>} : memref<1x8x128xf32, #tpu.memory_space<vmem>>, vector<1x8x128xf32>,
    return
  }
  func.func @transform_0(%arg0: i32, %arg1: i32) -> (i32, i32, i32) {
    %c0_i32 = arith.constant 0 : i32
    %c0_i32_0 = arith.constant 0 : i32
    %c0_i32_1 = arith.constant 0 : i32
    return %arg0, %c0_i32, %c0_i32_0 : i32, i32, i32
  }
  func.func @transform_1(%arg0: i32, %arg1: i32) -> (i32, i32) {
    %c0_i32 = arith.constant 0 : i32
    %c0_i32_0 = arith.constant 0 : i32
    %c0_i32_1 = arith.constant 0 : i32
    return %c0_i32, %c0_i32_0 : i32, i32
  }
  func.func @transform_2(%arg0: i32, %arg1: i32) -> (i32, i32, i32) {
    %c0_i32 = arith.constant 0 : i32
    %c0_i32_0 = arith.constant 0 : i32
    return %arg0, %arg1, %c0_i32 : i32, i32, i32
  }
  func.func @transform_3(%arg0: i32, %arg1: i32) -> (i32, i32, i32) {
    %c0_i32 = arith.constant 0 : i32
    %c0_i32_0 = arith.constant 0 : i32
    return %arg0, %c0_i32, %arg1 : i32, i32, i32
  }
}

</mosaic_0001>

<bundles_post_ra>
// kernel: tpu_custom_call.1
= control target key start
LH: loop header
LB: loop body
LE: loop exit
PB: predicated region body
PF: predicated region fallthrough
CT: control target
= control target key end

     0   :  { %s3753_s0 = inlined_call_operand.hbm [shape: f32[2,8,128], index: 0, kind: input, shape index: {}]   ;;  %s3754_s1 = inlined_call_operand.hbm [shape: f32[128,128], index: 1, kind: input, shape index: {}]   ;;  %s3755_s2 = inlined_call_operand.hbm [shape: f32[2,512,128], index: 2, kind: input, shape index: {}]   ;;  %s3756_s3 = inlined_call_operand.hbm [shape: f32[2,8,512], index: 3, kind: output, shape index: {}]  }
   0x1   :  { %3773 = sst [smem:[#allocation25_spill]] %s3753_s0 }
   0x2   :  { %3774 = sst [smem:[#allocation26_spill]] %s3756_s3 }
   0x3   :  { %8 = vsyncpa [#allocation4], 0 }
   0x4   :  { %10 = vsyncpa [#allocation4 + $0x1], 0 }
   0x5   :  { %11 = vsyncpa [#allocation7], 0 }
   0x6   :  { %12 = vsyncpa [#allocation5], 0 }
   0x7   :  { %14 = vsyncpa [#allocation5 + $0x1], 0  ;;  %s2723_s12 = smov 0   ;;  %s2725_s13 = smov 0  }
   0x8   :  { %s2727_s14 = smov 0   ;;  %s2729_s15 = smov 0  }
   0x9   :  { %s2731_s16 = smov 0   ;;  %s2733_s17 = smov 0  }
   0xa   :  { %s2735_s18 = smov 0   ;;  %s2737_s19 = smov 0  }
   0xb   :  { %s2739_s20 = smov 0   ;;  %s2741_s21 = smov 0  }
   0xc   :  { %s2743_s22 = smov 0  }
   0xd LB: > { %3775 = sst [smem:[#allocation14_spill]] %s2651_s12  ;;  %s1712_s23 = sadd.s32 4294967294, %s2691_s22   ;;  %s2691_s22 = sphi %s2743_s22, %s20_s22   ;;  %s2687_s21 = sphi %s2741_s21, %s3819_s21   ;;  %s2683_s20 = sphi %s2739_s20, %s3812_s20   ;;  %s2679_s19 = sphi %s2737_s19, %s3818_s19   ;;  %s2675_s18 = sphi %s2735_s18, %s3811_s18   ;;  %s2671_s17 = sphi %s2733_s17, %s3810_s17   ;;  %s2667_s16 = sphi %s2731_s16, %s3817_s16   ;;  %s2663_s15 = sphi %s2729_s15, %s3816_s15   ;;  %s2659_s14 = sphi %s2727_s14, %s3808_s14   ;;  %s2655_s13 = sphi %s2725_s13, %s3815_s13   ;;  %s2651_s12 = sphi %s2723_s12, %s3814_s12  }
   0xe   : > { %3776 = sst [smem:[#allocation15_spill]] %s2659_s14  ;;  %s29_s24 = sadd.s32 1, %s2683_s20 }
   0xf   : > { %3777 = sst [smem:[#allocation16_spill]] %s2671_s17  ;;  %p30_p0 = scmp.ge.s32.totalorder %s29_s24, 4 }
  0x10   : > { %3778 = sst [smem:[#allocation17_spill]] %s2683_s20  ;;  %s32_s25 = sadd.s32 1, %s2687_s21 }
  0x11   : > { %3779 = sst [smem:[#allocation18_spill]] %s2691_s22  ;;  %s39_s26 = sadd.s32 1, %s2671_s17 }
  0x12   : > { %p46_p1 = scmp.ne.s32.totalorder %s2671_s17, %s2667_s16  ;;  %s3821_s24 = smov (%p30_p0, %s29_s24), 0 }
  0x13   : > { %3780 = sst [smem:[#allocation19_spill]] %s3821_s24  ;;  %s3823_s25 = smov (!%p30_p0, %s32_s25), %s2687_s21 }
  0x14   : > { %p47_p2 = scmp.eq.s32.totalorder %s2691_s22, 0  ;;  %p52_p3 = scmp.ne.s32.totalorder %s2667_s16, %s2663_s15 }
  0x15   : > { %p34_p4 = scmp.ge.s32.totalorder %s3823_s25, 2  ;;  %s84_s27 = ssub.s32 %s2683_s20, %s3821_s24 }
  0x16   : > { %p2794_p5 = por %p47_p2, %p46_p1  ;;  %s88_s29 = sadd.s32 1, %s2659_s14 }
  0x17   : > { %s3825_s25 = smov (%p34_p4, %s3823_s25), 0  ;;  %p3759_p6 = scmp.ne.s32.totalorder %s2659_s14, %s2655_s13 }
  0x18   : > { %3782 = sst [smem:[#allocation20_spill]] %s3825_s25  ;;  %p3760_p7 = scmp.ne.s32.totalorder %s2655_s13, %s2651_s12 }
  0x19   : > { %s36_s30 = ssub.s32 %s2687_s21, %s3825_s25  ;;  %p133_p8 = scmp.eq.s32.totalorder %s1712_s23, 7 }
  0x1a   : > { %p37_p9 = scmp.eq.s32.totalorder %s36_s30, 0  ;;  %s85_s4 = sor.u32 %s84_s27, %s36_s30 }
  0x1b   : > { %p86_p10 = scmp.eq.s32.totalorder %s85_s4, 0  ;;  %p2812_p11 = por %p3759_p6, %p47_p2 }
  0x1c   : > { %s2817_s6 = scalar_select %p37_p9, %s2671_s17, %s39_s26  }
  0x1d   : > { %s2820_s7 = scalar_select %p86_p10, %s2659_s14, %s88_s29  }
  0x1e   : > { %3784 = sst [smem:[#allocation21_spill]] %s2817_s6  ;;  %p2825_p12 = por %p133_p8, %p3760_p7 }
  0x1f   : > { %3785 = sst [smem:[#allocation22_spill]] %s2820_s7  ;;  %p2383_p13 = scmp.lt.s32.totalorder %s2691_s22, 8 }
  0x20   : > { %s3786_s8 = scalar_select %p2825_p12, 1, 0 }
  0x21   : > { %s166_s9 = sand.u32 1, %s2691_s22   ;;  %s168_s10 = sand.u32 1, %s2671_s17  }
  0x22   : > { %3787 = sst [smem:[#allocation23_spill]] %s3786_s8  ;;  %s1716_s11 = sshll.u32 %s168_s10, 3 }
  0x23   : > { %s1717_s23 = sshll.u32 %s2687_s21, 7  ;;  %s3788_s0 = sld [smem:[#allocation25_spill]] }
  0x24   : > { %s170_s25 = scalar_lea.vmem [#allocation3], %s1716_s11  ;;  %p2838_p0 = pnand %p2383_p13, %p2794_p5 }
  0x25   : > { %s177_s24 = sshll.u32 %s170_s25, 4  ;;  %p2844_p1 = pnand %p2383_p13, %p2812_p11  ;;  %s178_s24 = int_to_ptr.vmem [resolvable:$true] %s177_s24 }
  0x26   : > { %s2848_s10 = scalar_lea.sflag [#allocation4], %s166_s9  ;;  %p2483_p2 = pneg %p2838_p0 }
  0x27   : > { %s2494_s27 = scalar_lea.vmem %s178_s24, 128  ;;  %s2693_s25 = smov [#allocation3]  }
  0x28   : > { %p2495_p4 = scmp.ne.s32.totalorder %s178_s24, %s2494_s27  ;;  %s2499_s28 = sshll.u32 %s2693_s25, 4  ;;  %s2500_s28 = int_to_ptr.vmem [resolvable:$false] %s2499_s28 }
  0x29   : > { %s175_s4 = scalar_lea.hbm %s3788_s0, %s1717_s23  ;;  %s2501_s11 = scalar_lea.vmem %s2500_s28, 256 }
  0x2a   : > { %p2497_p8 = pnand %p2495_p4, %p2483_p2  ;;  %p2502_p5 = scmp.lt.s32.totalorder %s178_s24, %s2500_s28 }
  0x2b   : > { %p2503_p10 = scmp.lt.s32.totalorder %s2501_s11, %s2494_s27 }
  0x2c   : > { %p2498_p9 = pneg %p2497_p8 }
  0x2d   : > { %p2504_p6 = por %p2503_p10, %p2502_p5 }
  0x2f   : > { %p2505_p7 = pnand %p2504_p6, %p2498_p9 }
  0x31   : > { %2508 = shalt.err (!%p2505_p7)
}
  0x32   : > { %2374 = dma.hbm_to_vmem [thread:$0]  (!%p2838_p0), %s175_s4, 128, %s178_s24, %s2848_s10  }
  0x33   : > { %s2856_s5 = sadd.s32 4294967295, %s2691_s22   ;;  %p1713_p6 = scmp.ge.s32.totalorder %s2691_s22, 1 }
  0x34   : > { %p53_p7 = scmp.eq.s32.totalorder %s2856_s5, 0  ;;  %p127_p11 = scmp.eq.s32.totalorder %s2856_s5, 7 }
  0x35   : > { %p140_p13 = scmp.lt.s32.totalorder %s2691_s22, 9  ;;  %p3792_p0 = scmp.ne.s32.totalorder %s2655_s13, %s2651_s12 }
  0x36   : > { %p2867_p2 = por %p53_p7, %p52_p3  ;;  %p3794_p8 = scmp.ne.s32.totalorder %s2659_s14, %s2655_s13 }
  0x37   : > { %p2876_p4 = por %p3792_p0, %p53_p7  ;;  %p2887_p5 = pnand %p1713_p6, %p140_p13 }
  0x38   : > { %p2883_p9 = por %p127_p11, %p3794_p8  ;;  %s2694_s15 = smov [#allocation6]  }
  0x39   : > { %s3793_s24 = scalar_select %p2876_p4, 1, 0 }
  0x3a   : > { %s3795_s23 = scalar_select %p2883_p9, 1, 0 }
  0x3b   : > { %p2367_p3 = pneg %p2887_p5  ;;  %s152_s4 = sshll.u32 %s2694_s15, 4  ;;  %s153_s4 = int_to_ptr.vmem [resolvable:$true] %s152_s4 }
  0x3c   : > { %3796 = sst [smem:[#allocation24_spill]] %s3795_s23  ;;  %s186_s27 = sand.u32 1, %s2659_s14  }
  0x3d   : > { %p2895_p10 = pnand %p2367_p3, %p53_p7  ;;  %s1718_s25 = sshll.u32 %s186_s27, 7 }
  0x3e   : > { %s1719_s28 = sshll.u32 %s2683_s20, 4  ;;  %s2520_s11 = scalar_lea.vmem %s153_s4, 2048 }
  0x3f   : > { %p2511_p6 = pneg %p2895_p10  ;;  %p2521_p11 = scmp.ne.s32.totalorder %s153_s4, %s2520_s11 }
  0x40   : > { %p2528_p8 = scmp.lt.s32.totalorder %s153_s4, %s153_s4  ;;  %p2529_p12 = scmp.lt.s32.totalorder %s2520_s11, %s2520_s11 }
  0x41   : > { %p2523_p13 = pnand %p2521_p11, %p2511_p6 }
  0x42   : > { %p2530_p9 = por %p2529_p12, %p2528_p8 }
  0x43   : > { %p2524_p0 = pneg %p2523_p13 }
  0x45   : > { %p2531_p4 = pnand %p2530_p9, %p2524_p0 }
  0x47   : > { %2534 = shalt.err (!%p2531_p4)
}
  0x48   : > { %s2695_s15 = smov 128   ;;  %s2696_s0 = smov 8  }
  0x49   : > { %2370 = dma.hbm_to_vmem [thread:$0]  (!%p2895_p10), %s3754_s1, 2048, %s153_s4, [#allocation7], %s2695_s15, %s2695_s15, %s2696_s0  }
  0x4a   : > { %s1720_s20 = sshll.u32 %s2687_s21, 6  ;;  %s188_s17 = scalar_lea.vmem [#allocation8], %s1718_s25 }
  0x4b   : > { %s197_s7 = sshll.u32 %s188_s17, 4  ;;  %s194_s14 = sadd.s32 %s1720_s20, %s1719_s28  ;;  %s198_s7 = int_to_ptr.vmem [resolvable:$true] %s197_s7 }
  0x4c   : > { %s1721_s8 = sshll.u32 %s194_s14, 7  ;;  %p2537_p12 = pneg %p2844_p1 }
  0x4d   : > { %s196_s22 = scalar_lea.hbm %s3755_s2, %s1721_s8  ;;  %s2548_s3 = scalar_lea.vmem %s198_s7, 2048 }
  0x4e   : > { %p2549_p4 = scmp.ne.s32.totalorder %s198_s7, %s2548_s3  ;;  %s2697_s26 = smov [#allocation8]  }
  0x4f   : > { %s2553_s23 = sshll.u32 %s2697_s26, 4  ;;  %s2554_s23 = int_to_ptr.vmem [resolvable:$false] %s2553_s23 }
  0x50   : > { %p2551_p9 = pnand %p2549_p4, %p2537_p12  ;;  %s2555_s6 = scalar_lea.vmem %s2554_s23, 4096 }
  0x51   : > { %p2556_p10 = scmp.lt.s32.totalorder %s198_s7, %s2554_s23  ;;  %p2557_p6 = scmp.lt.s32.totalorder %s2555_s6, %s2548_s3 }
  0x52   : > { %p2552_p3 = pneg %p2551_p9 }
  0x53   : > { %p2558_p11 = por %p2557_p6, %p2556_p10 }
  0x55   : > { %p2559_p13 = pnand %p2558_p11, %p2552_p3 }
  0x57   : > { %2562 = shalt.err (!%p2559_p13)
}
  0x58   : > { %2377 = dma.hbm_to_vmem [thread:$0]  (!%p2844_p1), %s196_s22, 2048, %s198_s7, %s2848_s10, %s2695_s15, %s2695_s15, %s2696_s0  }
  0x59   : > { %209 = sbr.rel (%p2887_p5) target bundleno = 824 (0x338), region = 32  ;;  %s211_s12 = sand.u32 (!%p2887_p5), 1, %s2856_s5  }
  0x5a   : > { %s213_s14 = sand.u32 (!%p2887_p5), 1, %s2667_s16   ;;  %s212_s20 = scalar_lea.sflag (!%p2887_p5), [#allocation4], %s211_s12 }
  0x5b   : > { %s2921_s17 = sshll.u32 (!%p2887_p5), %s213_s14, 3 }
  0x5c   : > { %s215_s3 = scalar_lea.vmem (!%p2887_p5), [#allocation3], %s2921_s17 }
  0x5e   : > { %2634 = dma.done.wait (%p2867_p2), %s212_s20, 128  }
  0x5f   : > { %2636 = vsyncadd (%p2867_p2), %s212_s20, 4294967168 }
  0x60   : > { %2638 = dma.done.wait (%p53_p7), [#allocation7], 2048  }
  0x61   : > { %2640 = vsyncadd (%p53_p7), [#allocation7], 4294965248  ;;  %s2933_s0 = sand.u32 1, %s2655_s13   ;;  %p3799_p1 = scmp.ne.s32.totalorder %s3793_s24, 0 }
  0x62   : > { %s1725_s22 = sshll.u32 %s2933_s0, 7 }
  0x63   : > { %s2936_s7 = scalar_lea.vmem [#allocation8], %s1725_s22 }
  0x64   : > { %2642 = dma.done.wait (%p3799_p1), %s212_s20, 2048  }
  0x65   : > { %2644 = vsyncadd (%p3799_p1), %s212_s20, 4294965248  ;;  %s1726_s8 = sshll.u32 %s2933_s0, 3  ;;  %p1727_p2 = scmp.ne.s32.totalorder %s2675_s18, 0 }
  0x66   : > { %s2943_s29 = scalar_lea.vmem [#allocation9], %s1726_s8 }
  0x67   : > { %260 = sbr.rel (%p1727_p2) target bundleno = 414 (0x19e), region = 48 }
  0x6c   : > { %v277_v0 = vld [vmem:[#allocation6 + $0x78] sm:$0xff]  ;;  %v276_v1 = vld [vmem:[#allocation6 + $0x70] sm:$0xff]  ;;  %v275_v2 = vld [vmem:[#allocation6 + $0x68] sm:$0xff]  ;;  %v2698_v3 = vmov 0.0   ;;  %vm2699_vm0 = vmmov 0  }
  0x6d   : > { %1937 = vmatprep.subr.mxu0 %v2698_v3  ;;  %v2947_v4 = vand.u32 4294901760, %v277_v0  ;;  %v2949_v5 = vand.u32 4294901760, %v276_v1  ;;  %v2951_v6 = vand.u32 4294901760, %v275_v2  ;;  %v274_v7 = vld [vmem:[#allocation6 + $0x60] sm:$0xff]  ;;  %1972 = vmatprep.subr.mxu1 %v2698_v3  ;;  %v273_v8 = vld [vmem:[#allocation6 + $0x58] sm:$0xff]  ;;  %v272_v9 = vld [vmem:[#allocation6 + $0x50] sm:$0xff] }
  0x6e   : > { %v2954_v10 = vand.u32 4294901760, %v274_v7  ;;  %v2956_v11 = vand.u32 4294901760, %v273_v8  ;;  %v2958_v12 = vand.u32 4294901760, %v272_v9  ;;  %v271_v13 = vld [vmem:[#allocation6 + $0x48] sm:$0xff]  ;;  %v270_v14 = vld [vmem:[#allocation6 + $0x40] sm:$0xff]  ;;  %1969 = vmatprep.mubr.msk.f32.mxu0 %vm2699_vm0, %v2698_v3  ;;  %2004 = vmatprep.mubr.msk.f32.mxu1 %vm2699_vm0, %v2698_v3  ;;  %v269_v19 = vld [vmem:[#allocation6 + $0x38] sm:$0xff] }
  0x6f   : > { %1938 = vmatpush3.msra.mxu0 %v2947_v4  ;;  %v2966_v15 = vsub.f32 %v277_v0, %v2947_v4  ;;  %v2969_v16 = vsub.f32 %v276_v1, %v2949_v5  ;;  %v2971_v17 = vand.u32 4294901760, %v271_v13  ;;  %v2974_v18 = vsub.f32 %v275_v2, %v2951_v6  ;;  %v268_v26 = vld [vmem:[#allocation6 + $0x30] sm:$0xff]  ;;  %v267_v36 = vld [vmem:[#allocation6 + $0x28] sm:$0xff]  ;;  %v266_v41 = vld [vmem:[#allocation6 + $0x20] sm:$0xff] }
  0x70   : > { %1939 = vmatprep.subr.mxu0 %v2698_v3  ;;  %v2978_v20 = vsub.f32 %v274_v7, %v2954_v10  ;;  %v2981_v21 = vsub.f32 %v273_v8, %v2956_v11  ;;  %v2987_v25 = vand.u32 4294901760, %v270_v14  ;;  %v2991_v28 = vand.u32 4294901760, %v269_v19  ;;  %v265_v49 = vld [vmem:[#allocation6 + $0x18] sm:$0xff]  ;;  %v264_v54 = vld [vmem:[#allocation6 + $0x10] sm:$0xff]  ;;  %v263_v60 = vld [vmem:[#allocation6 + $0x8] sm:$0xff] }
  0x71   : > { %1940 = vmatpush3.msra.mxu0 %v2949_v5  ;;  %v372_v22 = vand.u32 4294901760, %v2966_v15  ;;  %v379_v23 = vand.u32 4294901760, %v2969_v16  ;;  %v386_v24 = vand.u32 4294901760, %v2974_v18  ;;  %v2995_v30 = vsub.f32 %v272_v9, %v2958_v12  ;;  %v261_v50 = vld [vmem:[%s215_s3] sm:$0xff]  ;;  %v262_v7 = vld [vmem:[#allocation6] sm:$0xff] }
  0x72   : > { %1941 = vmatprep.subr.mxu0 %v2698_v3  ;;  %v393_v27 = vand.u32 4294901760, %v2978_v20  ;;  %v400_v29 = vand.u32 4294901760, %v2981_v21  ;;  %v3008_v34 = vsub.f32 %v271_v13, %v2971_v17  ;;  %v3011_v35 = vand.u32 4294901760, %v268_v26 }
  0x73   : > { %1942 = vmatpush3.msra.mxu0 %v2951_v6  ;;  %v373_v31 = vsub.f32 %v2966_v15, %v372_v22  ;;  %v380_v32 = vsub.f32 %v2969_v16, %v379_v23  ;;  %v387_v33 = vsub.f32 %v2974_v18, %v386_v24  ;;  %v407_v40 = vand.u32 4294901760, %v2995_v30 }
  0x74   : > { %1943 = vmatprep.subr.mxu0 %v2698_v3  ;;  %v394_v39 = vsub.f32 %v2978_v20, %v393_v27  ;;  %v401_v42 = vsub.f32 %v2981_v21, %v400_v29  ;;  %v3023_v43 = vsub.f32 %v270_v14, %v2987_v25  ;;  %v3026_v45 = vand.u32 4294901760, %v267_v36 }
  0x75   : > { %1944 = vmatpush3.msra.mxu0 %v2954_v10  ;;  %v374_v37 = vand.u32 4294901760, %v373_v31  ;;  %v381_v38 = vand.u32 4294901760, %v380_v32  ;;  %v388_v44 = vand.u32 4294901760, %v387_v33  ;;  %v414_v46 = vand.u32 4294901760, %v3008_v34 }
  0x76   : > { %1945 = vmatprep.subr.mxu0 %v2698_v3  ;;  %v3030_v47 = vsub.f32 %v269_v19, %v2991_v28  ;;  %v3034_v48 = vand.u32 4294901760, %v266_v41  ;;  %v395_v51 = vand.u32 4294901760, %v394_v39  ;;  %v408_v52 = vsub.f32 %v2995_v30, %v407_v40 }
  0x77   : > { %1946 = vmatpush3.msra.mxu0 %v2956_v11  ;;  %1973 = vmatpush3.msra.mxu1 %v374_v37  ;;  %v421_v53 = vand.u32 4294901760, %v3023_v43  ;;  %v3044_v55 = vsub.f32 %v268_v26, %v3011_v35  ;;  %v402_v56 = vand.u32 4294901760, %v401_v42  ;;  %v415_v58 = vsub.f32 %v3008_v34, %v414_v46 }
  0x78   : > { %1947 = vmatprep.subr.mxu0 %v2698_v3  ;;  %1974 = vmatprep.subr.mxu1 %v2698_v3  ;;  %v428_v57 = vand.u32 4294901760, %v3030_v47  ;;  %v3053_v59 = vand.u32 4294901760, %v265_v49  ;;  %v3056_v61 = vsub.f32 %v267_v36, %v3026_v45  ;;  %v3058_v62 = vand.u32 4294901760, %v261_v50 }
  0x79   : > { %1948 = vmatpush3.msra.mxu0 %v2958_v12  ;;  %1975 = vmatpush3.msra.mxu1 %v381_v38  ;;  %v3062_v63 = vand.u32 4294901760, %v264_v54  ;;  %v409_v0 = vand.u32 4294901760, %v408_v52  ;;  %v422_v1 = vsub.f32 %v3023_v43, %v421_v53  ;;  %v435_v2 = vand.u32 4294901760, %v3044_v55 }
  0x7a   : > { %1949 = vmatprep.subr.mxu0 %v2698_v3  ;;  %1976 = vmatprep.subr.mxu1 %v2698_v3  ;;  %v3070_v8 = vsub.f32 %v266_v41, %v3034_v48  ;;  %v429_v9 = vsub.f32 %v3030_v47, %v428_v57  ;;  %v3077_v13 = vand.u32 4294901760, %v263_v60  ;;  %v416_v14 = vand.u32 4294901760, %v415_v58 }
  0x7b   : > { %1950 = vmatpush3.msra.mxu0 %v2971_v17  ;;  %1977 = vmatpush3.msra.mxu1 %v388_v44  ;;  %v442_v19 = vand.u32 4294901760, %v3056_v61  ;;  %v3082_v26 = vsub.f32 %v261_v50, %v3058_v62  ;;  %v3085_v31 = vsub.f32 %v265_v49, %v3053_v59  ;;  %v3089_v32 = vand.u32 4294901760, %v262_v7 }
  0x7c   : > { %1951 = vmatprep.subr.mxu0 %v2698_v3  ;;  %1978 = vmatprep.subr.mxu1 %v2698_v3  ;;  %v423_v33 = vand.u32 4294901760, %v422_v1  ;;  %v436_v36 = vsub.f32 %v3044_v55, %v435_v2  ;;  %v449_v37 = vand.u32 4294901760, %v3070_v8  ;;  %v3097_v38 = vsub.f32 %v264_v54, %v3062_v63 }
  0x7d   : > { %1952 = vmatpush3.msra.mxu0 %v2987_v25  ;;  %1979 = vmatpush3.msra.mxu1 %v395_v51  ;;  %v430_v39 = vand.u32 4294901760, %v429_v9  ;;  %v443_v41 = vsub.f32 %v3056_v61, %v442_v19  ;;  %v361_v42 = vand.u32 4294901760, %v3082_v26  ;;  %v456_v44 = vand.u32 4294901760, %v3085_v31 }
  0x7e   : > { %1953 = vmatprep.subr.mxu0 %v2698_v3  ;;  %1980 = vmatprep.subr.mxu1 %v2698_v3  ;;  %v3108_v49 = vsub.f32 %v263_v60, %v3077_v13  ;;  %v437_v50 = vand.u32 4294901760, %v436_v36  ;;  %v450_v51 = vsub.f32 %v3070_v8, %v449_v37  ;;  %v463_v52 = vand.u32 4294901760, %v3097_v38 }
  0x7f   : > { %1954 = vmatpush3.msra.mxu0 %v2991_v28  ;;  %1981 = vmatpush3.msra.mxu1 %v402_v56  ;;  %v3118_v54 = vsub.f32 %v262_v7, %v3089_v32  ;;  %v444_v56 = vand.u32 4294901760, %v443_v41  ;;  %v362_v58 = vsub.f32 %v3082_v26, %v361_v42  ;;  %v457_v60 = vsub.f32 %v3085_v31, %v456_v44 }
  0x80   : > { %1955 = vmatprep.subr.mxu0 %v2698_v3  ;;  %1982 = vmatprep.subr.mxu1 %v2698_v3  ;;  %v451_v1 = vand.u32 4294901760, %v450_v51  ;;  %v464_v7 = vsub.f32 %v3097_v38, %v463_v52 }
  0x81   : > { %1956 = vmatpush3.msra.mxu0 %v3011_v35  ;;  %1983 = vmatpush3.msra.mxu1 %v409_v0  ;;  %v470_v0 = vand.u32 4294901760, %v3108_v49  ;;  %v477_v9 = vand.u32 4294901760, %v3118_v54 }
  0x82   : > { %1957 = vmatprep.subr.mxu0 %v2698_v3  ;;  %1984 = vmatprep.subr.mxu1 %v2698_v3 }
  0x83   : > { %1958 = vmatpush3.msra.mxu0 %v3026_v45  ;;  %1985 = vmatpush3.msra.mxu1 %v416_v14  ;;  %v363_v14 = vand.u32 4294901760, %v362_v58  ;;  %v471_v36 = vsub.f32 %v3108_v49, %v470_v0  ;;  %v478_v41 = vsub.f32 %v3118_v54, %v477_v9 }
  0x84   : > { %1959 = vmatprep.subr.mxu0 %v2698_v3  ;;  %1986 = vmatprep.subr.mxu1 %v2698_v3 }
  0x85   : > { %1960 = vmatpush3.msra.mxu0 %v3034_v48  ;;  %1987 = vmatpush3.msra.mxu1 %v423_v33  ;;  %v458_v33 = vand.u32 4294901760, %v457_v60  ;;  %v479_v51 = vand.u32 4294901760, %v478_v41 }
  0x86   : > { %1961 = vmatprep.subr.mxu0 %v2698_v3  ;;  %1988 = vmatprep.subr.mxu1 %v2698_v3 }
  0x87   : > { %1962 = vmatpush3.msra.mxu0 %v3053_v59  ;;  %1989 = vmatpush3.msra.mxu1 %v430_v39  ;;  %v465_v39 = vand.u32 4294901760, %v464_v7 }
  0x88   : > { %1963 = vmatprep.subr.mxu0 %v2698_v3  ;;  %1990 = vmatprep.subr.mxu1 %v2698_v3 }
  0x89   : > { %1964 = vmatpush3.msra.mxu0 %v3062_v63  ;;  %1991 = vmatpush3.msra.mxu1 %v437_v50  ;;  %v472_v50 = vand.u32 4294901760, %v471_v36 }
  0x8a   : > { %1965 = vmatprep.subr.mxu0 %v2698_v3  ;;  %1992 = vmatprep.subr.mxu1 %v2698_v3 }
  0x8b   : > { %1966 = vmatpush3.msra.mxu0 %v3077_v13  ;;  %1993 = vmatpush3.msra.mxu1 %v444_v56 }
  0x8c   : > { %1967 = vmatprep.subr.mxu0 %v2698_v3  ;;  %1994 = vmatprep.subr.mxu1 %v2698_v3 }
  0x8d   : > { %1968 = vmatpush3.msra.mxu0 %v3089_v32  ;;  %1995 = vmatpush3.msra.mxu1 %v451_v1 }
  0x8e   : > { %1996 = vmatprep.subr.mxu1 %v2698_v3  ;;  %2007 = vmatprep.subr.mxu0 %v2698_v3 }
  0x8f   : > { %1970 = vmatmul.mubr.f32.vlgmr.msra.gmra.mxu0 %v363_v14  ;;  %1997 = vmatpush3.msra.mxu1 %v458_v33 }
  0x90   : > { %2008 = vmatpush3.msra.mxu0 %v2966_v15  ;;  %1998 = vmatprep.subr.mxu1 %v2698_v3 }
  0x91   : > { %2009 = vmatprep.subr.mxu0 %v2698_v3  ;;  %1999 = vmatpush3.msra.mxu1 %v465_v39 }
  0x92   : > { %2010 = vmatpush3.msra.mxu0 %v2969_v16  ;;  %2000 = vmatprep.subr.mxu1 %v2698_v3 }
  0x93   : > { %2011 = vmatprep.subr.mxu0 %v2698_v3  ;;  %2001 = vmatpush3.msra.mxu1 %v472_v50 }
  0x94   : > { %2012 = vmatpush3.msra.mxu0 %v2974_v18  ;;  %2002 = vmatprep.subr.mxu1 %v2698_v3 }
  0x95   : > { %2013 = vmatprep.subr.mxu0 %v2698_v3  ;;  %2003 = vmatpush3.msra.mxu1 %v479_v51 }
  0x96   : > { %2014 = vmatpush3.msra.mxu0 %v2978_v20  ;;  %2005 = vmatmul.mubr.f32.vlgmr.msra.gmra.mxu1 %v3058_v62 }
  0x97   : > { %2015 = vmatprep.subr.mxu0 %v2698_v3  ;;  %2042 = vmatprep.subr.mxu1 %v2698_v3 }
  0x98   : > { %2016 = vmatpush3.msra.mxu0 %v2981_v21  ;;  %2043 = vmatpush3.msra.mxu1 %v2947_v4 }
  0x99   : > { %2017 = vmatprep.subr.mxu0 %v2698_v3  ;;  %2044 = vmatprep.subr.mxu1 %v2698_v3 }
  0x9a   : > { %2018 = vmatpush3.msra.mxu0 %v2995_v30  ;;  %2045 = vmatpush3.msra.mxu1 %v2949_v5 }
  0x9b   : > { %2019 = vmatprep.subr.mxu0 %v2698_v3  ;;  %2046 = vmatprep.subr.mxu1 %v2698_v3 }
  0x9c   : > { %2020 = vmatpush3.msra.mxu0 %v3008_v34  ;;  %2047 = vmatpush3.msra.mxu1 %v2951_v6 }
  0x9d   : > { %2021 = vmatprep.subr.mxu0 %v2698_v3  ;;  %2048 = vmatprep.subr.mxu1 %v2698_v3 }
  0x9e   : > { %2022 = vmatpush3.msra.mxu0 %v3023_v43  ;;  %2049 = vmatpush3.msra.mxu1 %v2954_v10 }
  0x9f   : > { %2023 = vmatprep.subr.mxu0 %v2698_v3  ;;  %2050 = vmatprep.subr.mxu1 %v2698_v3 }
  0xa0   : > { %2024 = vmatpush3.msra.mxu0 %v3030_v47  ;;  %2051 = vmatpush3.msra.mxu1 %v2956_v11 }
  0xa1   : > { %2025 = vmatprep.subr.mxu0 %v2698_v3  ;;  %2052 = vmatprep.subr.mxu1 %v2698_v3 }
  0xa2   : > { %2026 = vmatpush3.msra.mxu0 %v3044_v55  ;;  %2053 = vmatpush3.msra.mxu1 %v2958_v12 }
  0xa3   : > { %2027 = vmatprep.subr.mxu0 %v2698_v3  ;;  %2054 = vmatprep.subr.mxu1 %v2698_v3 }
  0xa4   : > { %2028 = vmatpush3.msra.mxu0 %v3056_v61  ;;  %2055 = vmatpush3.msra.mxu1 %v2971_v17 }
  0xa5   : > { %2029 = vmatprep.subr.mxu0 %v2698_v3  ;;  %2056 = vmatprep.subr.mxu1 %v2698_v3 }
  0xa6   : > { %2030 = vmatpush3.msra.mxu0 %v3070_v8  ;;  %2057 = vmatpush3.msra.mxu1 %v2987_v25 }
  0xa7   : > { %2031 = vmatprep.subr.mxu0 %v2698_v3  ;;  %2058 = vmatprep.subr.mxu1 %v2698_v3 }
  0xa8   : > { %2032 = vmatpush3.msra.mxu0 %v3085_v31  ;;  %2059 = vmatpush3.msra.mxu1 %v2991_v28 }
  0xa9   : > { %2033 = vmatprep.subr.mxu0 %v2698_v3  ;;  %2060 = vmatprep.subr.mxu1 %v2698_v3 }
  0xaa   : > { %2034 = vmatpush3.msra.mxu0 %v3097_v38  ;;  %2061 = vmatpush3.msra.mxu1 %v3011_v35 }
  0xab   : > { %2035 = vmatprep.subr.mxu0 %v2698_v3  ;;  %2062 = vmatprep.subr.mxu1 %v2698_v3 }
  0xac   : > { %2036 = vmatpush3.msra.mxu0 %v3108_v49  ;;  %2063 = vmatpush3.msra.mxu1 %v3026_v45 }
  0xad   : > { %2037 = vmatprep.subr.mxu0 %v2698_v3  ;;  %2064 = vmatprep.subr.mxu1 %v2698_v3 }
  0xae   : > { %2038 = vmatpush3.msra.mxu0 %v3118_v54  ;;  %2039 = vmatprep.mubr.msk.f32.mxu0 %vm2699_vm0, %v2698_v3 }
  0xaf   : > { %2065 = vmatpush3.msra.mxu1 %v3034_v48  ;;  %2040 = vmatmul.mubr.f32.vlgmr.msra.gmra.mxu0 %v3082_v26 }
  0xb0   : > { %2066 = vmatprep.subr.mxu1 %v2698_v3  ;;  %2077 = vmatprep.subr.mxu0 %v2698_v3 }
  0xb1   : > { %2067 = vmatpush3.msra.mxu1 %v3053_v59  ;;  %2078 = vmatpush3.msra.mxu0 %v372_v22 }
  0xb2   : > { %2068 = vmatprep.subr.mxu1 %v2698_v3  ;;  %2079 = vmatprep.subr.mxu0 %v2698_v3 }
  0xb3   : > { %2069 = vmatpush3.msra.mxu1 %v3062_v63  ;;  %2080 = vmatpush3.msra.mxu0 %v379_v23 }
  0xb4   : > { %2070 = vmatprep.subr.mxu1 %v2698_v3  ;;  %2081 = vmatprep.subr.mxu0 %v2698_v3 }
  0xb5   : > { %2071 = vmatpush3.msra.mxu1 %v3077_v13  ;;  %2082 = vmatpush3.msra.mxu0 %v386_v24 }
  0xb6   : > { %2072 = vmatprep.subr.mxu1 %v2698_v3  ;;  %2083 = vmatprep.subr.mxu0 %v2698_v3 }
  0xb7   : > { %2073 = vmatpush3.msra.mxu1 %v3089_v32  ;;  %2074 = vmatprep.mubr.msk.f32.mxu1 %vm2699_vm0, %v2698_v3 }
  0xb8   : > { %2084 = vmatpush3.msra.mxu0 %v393_v27  ;;  %2075 = vmatmul.mubr.f32.vlgmr.msra.gmra.mxu1 %v361_v42 }
  0xb9   : > { %2085 = vmatprep.subr.mxu0 %v2698_v3  ;;  %2112 = vmatprep.subr.mxu1 %v2698_v3 }
  0xba   : > { %2086 = vmatpush3.msra.mxu0 %v400_v29  ;;  %2113 = vmatpush3.msra.mxu1 %v2947_v4 }
  0xbb   : > { %2087 = vmatprep.subr.mxu0 %v2698_v3  ;;  %2114 = vmatprep.subr.mxu1 %v2698_v3 }
  0xbc   : > { %2088 = vmatpush3.msra.mxu0 %v407_v40  ;;  %2115 = vmatpush3.msra.mxu1 %v2949_v5 }
  0xbd   : > { %2089 = vmatprep.subr.mxu0 %v2698_v3  ;;  %2116 = vmatprep.subr.mxu1 %v2698_v3 }
  0xbe   : > { %2090 = vmatpush3.msra.mxu0 %v414_v46  ;;  %2117 = vmatpush3.msra.mxu1 %v2951_v6 }
  0xbf   : > { %2091 = vmatprep.subr.mxu0 %v2698_v3  ;;  %2118 = vmatprep.subr.mxu1 %v2698_v3 }
  0xc0   : > { %2092 = vmatpush3.msra.mxu0 %v421_v53  ;;  %2119 = vmatpush3.msra.mxu1 %v2954_v10 }
  0xc1   : > { %2093 = vmatprep.subr.mxu0 %v2698_v3  ;;  %2120 = vmatprep.subr.mxu1 %v2698_v3 }
  0xc2   : > { %2094 = vmatpush3.msra.mxu0 %v428_v57  ;;  %2121 = vmatpush3.msra.mxu1 %v2956_v11 }
  0xc3   : > { %2095 = vmatprep.subr.mxu0 %v2698_v3  ;;  %2122 = vmatprep.subr.mxu1 %v2698_v3 }
  0xc4   : > { %2096 = vmatpush3.msra.mxu0 %v435_v2  ;;  %2123 = vmatpush3.msra.mxu1 %v2958_v12 }
  0xc5   : > { %2097 = vmatprep.subr.mxu0 %v2698_v3  ;;  %2124 = vmatprep.subr.mxu1 %v2698_v3 }
  0xc6   : > { %2098 = vmatpush3.msra.mxu0 %v442_v19  ;;  %2125 = vmatpush3.msra.mxu1 %v2971_v17 }
  0xc7   : > { %2099 = vmatprep.subr.mxu0 %v2698_v3  ;;  %2126 = vmatprep.subr.mxu1 %v2698_v3 }
  0xc8   : > { %2100 = vmatpush3.msra.mxu0 %v449_v37  ;;  %2127 = vmatpush3.msra.mxu1 %v2987_v25 }
  0xc9   : > { %2101 = vmatprep.subr.mxu0 %v2698_v3  ;;  %2128 = vmatprep.subr.mxu1 %v2698_v3 }
  0xca   : > { %2102 = vmatpush3.msra.mxu0 %v456_v44  ;;  %2129 = vmatpush3.msra.mxu1 %v2991_v28 }
  0xcb   : > { %2103 = vmatprep.subr.mxu0 %v2698_v3  ;;  %2130 = vmatprep.subr.mxu1 %v2698_v3 }
  0xcc   : > { %2104 = vmatpush3.msra.mxu0 %v463_v52  ;;  %2131 = vmatpush3.msra.mxu1 %v3011_v35 }
  0xcd   : > { %2105 = vmatprep.subr.mxu0 %v2698_v3  ;;  %2132 = vmatprep.subr.mxu1 %v2698_v3 }
  0xce   : > { %2106 = vmatpush3.msra.mxu0 %v470_v0  ;;  %2133 = vmatpush3.msra.mxu1 %v3026_v45 }
  0xcf   : > { %2107 = vmatprep.subr.mxu0 %v2698_v3  ;;  %2134 = vmatprep.subr.mxu1 %v2698_v3 }
  0xd0   : > { %2108 = vmatpush3.msra.mxu0 %v477_v9  ;;  %2109 = vmatprep.mubr.msk.f32.mxu0 %vm2699_vm0, %v2698_v3 }
  0xd1   : > { %2135 = vmatpush3.msra.mxu1 %v3034_v48  ;;  %2110 = vmatmul.mubr.f32.vlgmr.msra.gmra.mxu0 %v3058_v62 }
  0xd2   : > { %2136 = vmatprep.subr.mxu1 %v2698_v3  ;;  %2144 = vmatprep.mubr.msk.f32.mxu1 %vm2699_vm0, %v2698_v3 }
  0xd3   : > { %2137 = vmatpush3.msra.mxu1 %v3053_v59 }
  0xd4   : > { %2138 = vmatprep.subr.mxu1 %v2698_v3 }
  0xd5   : > { %2139 = vmatpush3.msra.mxu1 %v3062_v63 }
  0xd6   : > { %2140 = vmatprep.subr.mxu1 %v2698_v3 }
  0xd7   : > { %2141 = vmatpush3.msra.mxu1 %v3077_v13 }
  0xd8   : > { %2142 = vmatprep.subr.mxu1 %v2698_v3 }
  0xd9   : > { %2143 = vmatpush3.msra.mxu1 %v3089_v32 }
  0xda   : > { %2145 = vmatmul.mubr.f32.vlgmr.msra.gmra.mxu1 %v3058_v62 }
 0x14f   : > { %v365_v4 = vpop.f32.mrf.mxu0 }
 0x151   : > { %v1971_v5 = vpop.f32.mrf.mxu0 }
 0x156   : > { %v516_v6 = vpop.f32.mrf.mxu1 }
 0x157   : > { %v517_v18 = vadd.f32 %v516_v6, %v365_v4 }
 0x158   : > { %v2006_v10 = vpop.f32.mrf.mxu1 }
 0x16f   : > { %v620_v11 = vpop.f32.mrf.mxu0 }
 0x170   : > { %v621_v21 = vadd.f32 %v620_v11, %v517_v18 }
 0x171   : > { %v2041_v12 = vpop.f32.mrf.mxu0 }
 0x178   : > { %v709_v15 = vpop.f32.mrf.mxu1 }
 0x179   : > { %v710_v22 = vadd.f32 %v709_v15, %v621_v21 }
 0x17a   : > { %v2076_v16 = vpop.f32.mrf.mxu1 }
 0x191   : > { %v828_v17 = vpop.f32.mrf.mxu0 }
 0x192   : > { %v829_v23 = vadd.f32 %v828_v17, %v710_v22 }
 0x193   : > { %v2111_v20 = vpop.f32.mrf.mxu0 }
 0x19a   : > { %v915_v24 = vpop.f32.mrf.mxu1 }
 0x19b   : > { %v916_v3 = vadd.f32 %v915_v24, %v829_v23 }
 0x19c   : > { %v2146_v25 = vpop.f32.mrf.mxu1 }
 0x19d   : > { %919 = vst [vmem:[#allocation2] sm:$0xff] %v916_v3 }
 0x19e PF: > { %v936_v27 = vld [vmem:[%s2936_s7 + $0x78] sm:$0xff]  ;;  %v935_v28 = vld [vmem:[%s2936_s7 + $0x70] sm:$0xff]  ;;  %v934_v29 = vld [vmem:[%s2936_s7 + $0x68] sm:$0xff]  ;;  %v2700_v30 = vmov 0.0   ;;  %vm2701_vm1 = vmmov 0   ;;  %s1729_s10 = sshll.u32 %s2679_s19, 2 }
 0x19f   : > { %2147 = vmatprep.subr.mxu0 %v2700_v30  ;;  %v3315_v34 = vand.u32 4294901760, %v936_v27  ;;  %v3317_v35 = vand.u32 4294901760, %v935_v28  ;;  %2182 = vmatprep.subr.mxu1 %v2700_v30  ;;  %v3320_v40 = vand.u32 4294901760, %v934_v29  ;;  %v933_v43 = vld [vmem:[%s2936_s7 + $0x60] sm:$0xff]  ;;  %v932_v48 = vld [vmem:[%s2936_s7 + $0x58] sm:$0xff]  ;;  %v931_v2 = vld [vmem:[%s2936_s7 + $0x50] sm:$0xff]  ;;  %s1591_s9 = sadd.s32 %s2675_s18, %s1729_s10 }
 0x1a0   : > { %2179 = vmatprep.mubr.msk.f32.mxu0 %vm2701_vm1, %v2700_v30  ;;  %2214 = vmatprep.mubr.msk.f32.mxu1 %vm2701_vm1, %v2700_v30  ;;  %v3331_v46 = vand.u32 4294901760, %v933_v43  ;;  %v3343_v59 = vand.u32 4294901760, %v932_v48  ;;  %v3358_v19 = vand.u32 4294901760, %v931_v2  ;;  %v930_v37 = vld [vmem:[%s2936_s7 + $0x48] sm:$0xff]  ;;  %v929_v54 = vld [vmem:[%s2936_s7 + $0x40] sm:$0xff]  ;;  %v928_v7 = vld [vmem:[%s2936_s7 + $0x38] sm:$0xff] }
 0x1a1   : > { %2148 = vmatpush3.xpose.msra.mxu0 %v3315_v34  ;;  %v3329_v45 = vsub.f32 %v936_v27, %v3315_v34  ;;  %v3334_v47 = vsub.f32 %v935_v28, %v3317_v35  ;;  %v3338_v53 = vsub.f32 %v934_v29, %v3320_v40  ;;  %v3371_v42 = vand.u32 4294901760, %v930_v37  ;;  %v927_v41 = vld [vmem:[%s2936_s7 + $0x30] sm:$0xff]  ;;  %v926_v10 = vld [vmem:[%s2936_s7 + $0x28] sm:$0xff]  ;;  %v925_v18 = vld [vmem:[%s2936_s7 + $0x20] sm:$0xff]  ;;  %s3800_s5 = sld [smem:[#allocation24_spill]]  ;;  %s1730_s24 = sshll.u32 %s1591_s9, 7 }
 0x1a2   : > { %2149 = vmatprep.subr.mxu0 %v2700_v30  ;;  %v3355_v8 = vsub.f32 %v933_v43, %v3331_v46  ;;  %v3367_v38 = vsub.f32 %v932_v48, %v3343_v59  ;;  %v3380_v56 = vsub.f32 %v931_v2, %v3358_v19  ;;  %v3384_v58 = vand.u32 4294901760, %v929_v54  ;;  %v924_v3 = vld [vmem:[%s2936_s7 + $0x18] sm:$0xff]  ;;  %v923_v48 = vld [vmem:[%s2936_s7 + $0x10] sm:$0xff]  ;;  %s1595_s23 = sshll.u32 %s2943_s29, 4  ;;  %s3801_s25 = sld [smem:[#allocation26_spill]]  ;;  %s1596_s23 = int_to_ptr.vmem [resolvable:$true] %s1595_s23 }
 0x1a3   : > { %v1031_v55 = vand.u32 4294901760, %v3329_v45  ;;  %v1038_v57 = vand.u32 4294901760, %v3334_v47  ;;  %v1045_v63 = vand.u32 4294901760, %v3338_v53  ;;  %v3393_v9 = vsub.f32 %v930_v37, %v3371_v42  ;;  %s1580_s15 = scalar_lea.sflag [#allocation5], %s2933_s0  ;;  %s2563_s27 = scalar_lea.vmem %s1596_s23, 128 }
 0x1a4   : > { %v1052_v32 = vand.u32 4294901760, %v3355_v8  ;;  %v1059_v52 = vand.u32 4294901760, %v3367_v38  ;;  %v1066_v1 = vand.u32 4294901760, %v3380_v56  ;;  %v3397_v14 = vand.u32 4294901760, %v928_v7  ;;  %p2564_p7 = scmp.ne.s32.totalorder %s1596_s23, %s2563_s27  ;;  %s2702_s18 = smov [#allocation9]  }
 0x1a5   : > { %2150 = vmatpush3.xpose.msra.mxu0 %v3317_v35  ;;  %v1032_v61 = vsub.f32 %v3329_v45, %v1031_v55  ;;  %v1039_v62 = vsub.f32 %v3334_v47, %v1038_v57  ;;  %v1046_v31 = vsub.f32 %v3338_v53, %v1045_v63  ;;  %v1073_v39 = vand.u32 4294901760, %v3393_v9  ;;  %s2567_s19 = sshll.u32 %s2702_s18, 4  ;;  %s2568_s19 = int_to_ptr.vmem [resolvable:$false] %s2567_s19 }
 0x1a6   : > { %2151 = vmatprep.subr.mxu0 %v2700_v30  ;;  %v1053_v49 = vsub.f32 %v3355_v8, %v1052_v32  ;;  %v1060_v0 = vsub.f32 %v3367_v38, %v1059_v52  ;;  %v1067_v36 = vsub.f32 %v3380_v56, %v1066_v1  ;;  %v3406_v50 = vsub.f32 %v929_v54, %v3384_v58  ;;  %s2569_s11 = scalar_lea.vmem %s2568_s19, 256  ;;  %p2570_p12 = scmp.lt.s32.totalorder %s1596_s23, %s2568_s19 }
 0x1a7   : > { %v1033_v13 = vand.u32 4294901760, %v1032_v61  ;;  %v1040_v26 = vand.u32 4294901760, %v1039_v62  ;;  %v1047_v44 = vand.u32 4294901760, %v1046_v31  ;;  %v3410_v51 = vand.u32 4294901760, %v927_v41  ;;  %v922_v31 = vld [vmem:[%s2936_s7 + $0x8] sm:$0xff]  ;;  %p3802_p5 = scmp.ne.s32.totalorder %s3800_s5, 0  ;;  %p2571_p4 = scmp.lt.s32.totalorder %s2569_s11, %s2563_s27 }
 0x1a8   : > { %v1054_v60 = vand.u32 4294901760, %v1053_v49  ;;  %v1061_v33 = vand.u32 4294901760, %v1060_v0  ;;  %v1068_v4 = vand.u32 4294901760, %v1067_v36  ;;  %v1074_v5 = vsub.f32 %v3393_v9, %v1073_v39  ;;  %s3696_s28 = scalar_lea.hbm %s3801_s25, %s1730_s24 }
 0x1a9   : > { %2152 = vmatpush3.xpose.msra.mxu0 %v3320_v40  ;;  %2183 = vmatpush3.xpose.msra.mxu1 %v1033_v13  ;;  %v1080_v6 = vand.u32 4294901760, %v3406_v50  ;;  %v3419_v11 = vsub.f32 %v928_v7, %v3397_v14  ;;  %v3423_v12 = vand.u32 4294901760, %v926_v10  ;;  %v3432_v20 = vsub.f32 %v927_v41, %v3410_v51  ;;  %p2565_p0 = pnand %p2564_p7, %p3802_p5  ;;  %p2572_p9 = por %p2571_p4, %p2570_p12 }
 0x1aa   : > { %2153 = vmatprep.subr.mxu0 %v2700_v30  ;;  %2184 = vmatprep.subr.mxu1 %v2700_v30  ;;  %v1075_v15 = vand.u32 4294901760, %v1074_v5  ;;  %v3436_v21 = vand.u32 4294901760, %v925_v18  ;;  %v3449_v27 = vand.u32 4294901760, %v924_v3  ;;  %v3462_v62 = vand.u32 4294901760, %v923_v48 }
 0x1ab   : > { %v1081_v16 = vsub.f32 %v3406_v50, %v1080_v6  ;;  %v1087_v17 = vand.u32 4294901760, %v3419_v11  ;;  %v1094_v24 = vand.u32 4294901760, %v3432_v20  ;;  %v3445_v25 = vsub.f32 %v926_v10, %v3423_v12  ;;  %p2566_p8 = pneg %p2565_p0 }
 0x1ac   : > { %v3458_v61 = vsub.f32 %v925_v18, %v3436_v21  ;;  %v3471_v37 = vsub.f32 %v924_v3, %v3449_v27  ;;  %v3475_v49 = vand.u32 4294901760, %v922_v31  ;;  %v3486_v36 = vsub.f32 %v923_v48, %v3462_v62 }
 0x1ad   : > { %2154 = vmatpush3.xpose.msra.mxu0 %v3331_v46  ;;  %2185 = vmatpush3.xpose.msra.mxu1 %v1040_v26  ;;  %v1082_v22 = vand.u32 4294901760, %v1081_v16  ;;  %v1088_v23 = vsub.f32 %v3419_v11, %v1087_v17  ;;  %v1095_v29 = vsub.f32 %v3432_v20, %v1094_v24  ;;  %v1101_v43 = vand.u32 4294901760, %v3445_v25  ;;  %p2573_p3 = pnand %p2572_p9, %p2566_p8 }
 0x1ae   : > { %2155 = vmatprep.subr.mxu0 %v2700_v30  ;;  %2186 = vmatprep.subr.mxu1 %v2700_v30  ;;  %v1108_v26 = vand.u32 4294901760, %v3458_v61  ;;  %v1115_v7 = vand.u32 4294901760, %v3471_v37  ;;  %v3501_v16 = vsub.f32 %v922_v31, %v3475_v49 }
 0x1af   : > { %v1089_v28 = vand.u32 4294901760, %v1088_v23  ;;  %v1096_v2 = vand.u32 4294901760, %v1095_v29  ;;  %v1102_v13 = vsub.f32 %v3445_v25, %v1101_v43 }
 0x1b0   : > { %v1109_v0 = vsub.f32 %v3458_v61, %v1108_v26  ;;  %v1116_v10 = vsub.f32 %v3471_v37, %v1115_v7  ;;  %v1129_v3 = vand.u32 4294901760, %v3501_v16 }
 0x1b1   : > { %2156 = vmatpush3.xpose.msra.mxu0 %v3343_v59  ;;  %2187 = vmatpush3.xpose.msra.mxu1 %v1047_v44  ;;  %v920_v44 = vld [vmem:[#allocation2] sm:$0xff] }
 0x1b2   : > { %2157 = vmatprep.subr.mxu0 %v2700_v30  ;;  %2188 = vmatprep.subr.mxu1 %v2700_v30  ;;  %v3477_v54 = vand.u32 4294901760, %v920_v44  ;;  %v1110_v5 = vand.u32 4294901760, %v1109_v0 }
 0x1b5   : > { %2158 = vmatpush3.xpose.msra.mxu0 %v3358_v19  ;;  %2189 = vmatpush3.xpose.msra.mxu1 %v1054_v60  ;;  %v1103_v60 = vand.u32 4294901760, %v1102_v13 }
 0x1b6   : > { %2159 = vmatprep.subr.mxu0 %v2700_v30  ;;  %2190 = vmatprep.subr.mxu1 %v2700_v30 }
 0x1b9   : > { %2160 = vmatpush3.xpose.msra.mxu0 %v3371_v42  ;;  %2191 = vmatpush3.xpose.msra.mxu1 %v1061_v33  ;;  %v921_v33 = vld [vmem:[%s2936_s7] sm:$0xff] }
 0x1ba   : > { %2161 = vmatprep.subr.mxu0 %v2700_v30  ;;  %2192 = vmatprep.subr.mxu1 %v2700_v30  ;;  %v3490_v41 = vand.u32 4294901760, %v921_v33 }
 0x1bd   : > { %2162 = vmatpush3.xpose.msra.mxu0 %v3384_v58  ;;  %2193 = vmatpush3.xpose.msra.mxu1 %v1068_v4  ;;  %v3493_v4 = vsub.f32 %v920_v44, %v3477_v54 }
 0x1be   : > { %2163 = vmatprep.subr.mxu0 %v2700_v30  ;;  %2194 = vmatprep.subr.mxu1 %v2700_v30 }
 0x1bf   : > { %v1020_v18 = vand.u32 4294901760, %v3493_v4 }
 0x1c1   : > { %2164 = vmatpush3.xpose.msra.mxu0 %v3397_v14  ;;  %2195 = vmatpush3.xpose.msra.mxu1 %v1075_v15  ;;  %v1122_v15 = vand.u32 4294901760, %v3486_v36  ;;  %v1021_v29 = vsub.f32 %v3493_v4, %v1020_v18 }
 0x1c2   : > { %2165 = vmatprep.subr.mxu0 %v2700_v30  ;;  %2196 = vmatprep.subr.mxu1 %v2700_v30 }
 0x1c3   : > { %v1123_v23 = vsub.f32 %v3486_v36, %v1122_v15  ;;  %v1022_v31 = vand.u32 4294901760, %v1021_v29 }
 0x1c5   : > { %2166 = vmatpush3.xpose.msra.mxu0 %v3410_v51  ;;  %2197 = vmatpush3.xpose.msra.mxu1 %v1082_v22  ;;  %v1117_v22 = vand.u32 4294901760, %v1116_v10  ;;  %v1124_v48 = vand.u32 4294901760, %v1123_v23 }
 0x1c6   : > { %2167 = vmatprep.subr.mxu0 %v2700_v30  ;;  %2198 = vmatprep.subr.mxu1 %v2700_v30 }
 0x1c9   : > { %2168 = vmatpush3.xpose.msra.mxu0 %v3423_v12  ;;  %2199 = vmatpush3.xpose.msra.mxu1 %v1089_v28  ;;  %v3512_v28 = vsub.f32 %v921_v33, %v3490_v41 }
 0x1ca   : > { %2169 = vmatprep.subr.mxu0 %v2700_v30  ;;  %2200 = vmatprep.subr.mxu1 %v2700_v30 }
 0x1cb   : > { %v1136_v13 = vand.u32 4294901760, %v3512_v28 }
 0x1cd   : > { %2170 = vmatpush3.xpose.msra.mxu0 %v3436_v21  ;;  %2201 = vmatpush3.xpose.msra.mxu1 %v1096_v2  ;;  %v1130_v2 = vsub.f32 %v3501_v16, %v1129_v3 }
 0x1ce   : > { %2171 = vmatprep.subr.mxu0 %v2700_v30  ;;  %2202 = vmatprep.subr.mxu1 %v2700_v30 }
 0x1cf   : > { %v1131_v44 = vand.u32 4294901760, %v1130_v2 }
 0x1d1   : > { %2172 = vmatpush3.xpose.msra.mxu0 %v3449_v27  ;;  %2203 = vmatpush3.xpose.msra.mxu1 %v1103_v60  ;;  %v1137_v60 = vsub.f32 %v3512_v28, %v1136_v13 }
 0x1d2   : > { %2173 = vmatprep.subr.mxu0 %v2700_v30  ;;  %2204 = vmatprep.subr.mxu1 %v2700_v30 }
 0x1d3   : > { %v1138_v0 = vand.u32 4294901760, %v1137_v60 }
 0x1d5   : > { %2174 = vmatpush3.xpose.msra.mxu0 %v3462_v62  ;;  %2205 = vmatpush3.xpose.msra.mxu1 %v1110_v5 }
 0x1d6   : > { %2175 = vmatprep.subr.mxu0 %v2700_v30  ;;  %2206 = vmatprep.subr.mxu1 %v2700_v30 }
 0x1d9   : > { %2176 = vmatpush3.xpose.msra.mxu0 %v3475_v49  ;;  %2207 = vmatpush3.xpose.msra.mxu1 %v1117_v22 }
 0x1da   : > { %2177 = vmatprep.subr.mxu0 %v2700_v30  ;;  %2208 = vmatprep.subr.mxu1 %v2700_v30 }
 0x1dd   : > { %2178 = vmatpush3.xpose.msra.mxu0 %v3490_v41  ;;  %2209 = vmatpush3.xpose.msra.mxu1 %v1124_v48 }
 0x1de   : > { %2210 = vmatprep.subr.mxu1 %v2700_v30  ;;  %2217 = vmatprep.subr.mxu0 %v2700_v30 }
 0x1e0   : > { %2180 = vmatmul.mubr.f32.vlgmr.msra.gmra.mxu0 %v1022_v31 }
 0x1e1   : > { %2211 = vmatpush3.xpose.msra.mxu1 %v1131_v44  ;;  %2218 = vmatpush3.xpose.msra.mxu0 %v3329_v45 }
 0x1e2   : > { %2212 = vmatprep.subr.mxu1 %v2700_v30  ;;  %2219 = vmatprep.subr.mxu0 %v2700_v30 }
 0x1e3   : > { %2249 = vmatprep.mubr.msk.f32.mxu0 %vm2701_vm1, %v2700_v30 }
 0x1e5   : > { %2213 = vmatpush3.xpose.msra.mxu1 %v1138_v0  ;;  %2220 = vmatpush3.xpose.msra.mxu0 %v3334_v47 }
 0x1e6   : > { %2221 = vmatprep.subr.mxu0 %v2700_v30  ;;  %2252 = vmatprep.subr.mxu1 %v2700_v30 }
 0x1e8   : > { %2215 = vmatmul.mubr.f32.vlgmr.msra.gmra.mxu1 %v3477_v54 }
 0x1e9   : > { %2222 = vmatpush3.xpose.msra.mxu0 %v3338_v53  ;;  %2253 = vmatpush3.xpose.msra.mxu1 %v3315_v34 }
 0x1ea   : > { %2223 = vmatprep.subr.mxu0 %v2700_v30  ;;  %2254 = vmatprep.subr.mxu1 %v2700_v30 }
 0x1eb   : > { %2284 = vmatprep.mubr.msk.f32.mxu1 %vm2701_vm1, %v2700_v30 }
 0x1ed   : > { %2224 = vmatpush3.xpose.msra.mxu0 %v3355_v8  ;;  %2255 = vmatpush3.xpose.msra.mxu1 %v3317_v35 }
 0x1ee   : > { %2225 = vmatprep.subr.mxu0 %v2700_v30  ;;  %2256 = vmatprep.subr.mxu1 %v2700_v30 }
 0x1f1   : > { %2226 = vmatpush3.xpose.msra.mxu0 %v3367_v38  ;;  %2257 = vmatpush3.xpose.msra.mxu1 %v3320_v40 }
 0x1f2   : > { %2227 = vmatprep.subr.mxu0 %v2700_v30  ;;  %2258 = vmatprep.subr.mxu1 %v2700_v30 }
 0x1f5   : > { %2228 = vmatpush3.xpose.msra.mxu0 %v3380_v56  ;;  %2259 = vmatpush3.xpose.msra.mxu1 %v3331_v46 }
 0x1f6   : > { %2229 = vmatprep.subr.mxu0 %v2700_v30  ;;  %2260 = vmatprep.subr.mxu1 %v2700_v30 }
 0x1f9   : > { %2230 = vmatpush3.xpose.msra.mxu0 %v3393_v9  ;;  %2261 = vmatpush3.xpose.msra.mxu1 %v3343_v59 }
 0x1fa   : > { %2231 = vmatprep.subr.mxu0 %v2700_v30  ;;  %2262 = vmatprep.subr.mxu1 %v2700_v30 }
 0x1fd   : > { %2232 = vmatpush3.xpose.msra.mxu0 %v3406_v50  ;;  %2263 = vmatpush3.xpose.msra.mxu1 %v3358_v19 }
 0x1fe   : > { %2233 = vmatprep.subr.mxu0 %v2700_v30  ;;  %2264 = vmatprep.subr.mxu1 %v2700_v30 }
 0x201   : > { %2234 = vmatpush3.xpose.msra.mxu0 %v3419_v11  ;;  %2265 = vmatpush3.xpose.msra.mxu1 %v3371_v42 }
 0x202   : > { %2235 = vmatprep.subr.mxu0 %v2700_v30  ;;  %2266 = vmatprep.subr.mxu1 %v2700_v30 }
 0x205   : > { %2236 = vmatpush3.xpose.msra.mxu0 %v3432_v20  ;;  %2267 = vmatpush3.xpose.msra.mxu1 %v3384_v58 }
 0x206   : > { %2237 = vmatprep.subr.mxu0 %v2700_v30  ;;  %2268 = vmatprep.subr.mxu1 %v2700_v30 }
 0x209   : > { %2238 = vmatpush3.xpose.msra.mxu0 %v3445_v25  ;;  %2269 = vmatpush3.xpose.msra.mxu1 %v3397_v14 }
 0x20a   : > { %2239 = vmatprep.subr.mxu0 %v2700_v30  ;;  %2270 = vmatprep.subr.mxu1 %v2700_v30 }
 0x20d   : > { %2240 = vmatpush3.xpose.msra.mxu0 %v3458_v61  ;;  %2271 = vmatpush3.xpose.msra.mxu1 %v3410_v51 }
 0x20e   : > { %2241 = vmatprep.subr.mxu0 %v2700_v30  ;;  %2272 = vmatprep.subr.mxu1 %v2700_v30 }
 0x211   : > { %2242 = vmatpush3.xpose.msra.mxu0 %v3471_v37  ;;  %2273 = vmatpush3.xpose.msra.mxu1 %v3423_v12 }
 0x212   : > { %2243 = vmatprep.subr.mxu0 %v2700_v30  ;;  %2274 = vmatprep.subr.mxu1 %v2700_v30 }
 0x215   : > { %2244 = vmatpush3.xpose.msra.mxu0 %v3486_v36  ;;  %2275 = vmatpush3.xpose.msra.mxu1 %v3436_v21 }
 0x216   : > { %2245 = vmatprep.subr.mxu0 %v2700_v30  ;;  %2276 = vmatprep.subr.mxu1 %v2700_v30 }
 0x219   : > { %2246 = vmatpush3.xpose.msra.mxu0 %v3501_v16  ;;  %2277 = vmatpush3.xpose.msra.mxu1 %v3449_v27 }
 0x21a   : > { %2247 = vmatprep.subr.mxu0 %v2700_v30  ;;  %2278 = vmatprep.subr.mxu1 %v2700_v30 }
 0x21d   : > { %2248 = vmatpush3.xpose.msra.mxu0 %v3512_v28  ;;  %2279 = vmatpush3.xpose.msra.mxu1 %v3462_v62 }
 0x21e   : > { %2280 = vmatprep.subr.mxu1 %v2700_v30  ;;  %2287 = vmatprep.subr.mxu0 %v2700_v30 }
 0x220   : > { %2250 = vmatmul.mubr.f32.vlgmr.msra.gmra.mxu0 %v3493_v4 }
 0x221   : > { %2281 = vmatpush3.xpose.msra.mxu1 %v3475_v49  ;;  %2288 = vmatpush3.xpose.msra.mxu0 %v1031_v55 }
 0x222   : > { %2282 = vmatprep.subr.mxu1 %v2700_v30  ;;  %2289 = vmatprep.subr.mxu0 %v2700_v30 }
 0x223   : > { %2319 = vmatprep.mubr.msk.f32.mxu0 %vm2701_vm1, %v2700_v30 }
 0x225   : > { %2283 = vmatpush3.xpose.msra.mxu1 %v3490_v41  ;;  %2290 = vmatpush3.xpose.msra.mxu0 %v1038_v57 }
 0x226   : > { %2291 = vmatprep.subr.mxu0 %v2700_v30  ;;  %2322 = vmatprep.subr.mxu1 %v2700_v30 }
 0x228   : > { %2285 = vmatmul.mubr.f32.vlgmr.msra.gmra.mxu1 %v1020_v18 }
 0x229   : > { %2292 = vmatpush3.xpose.msra.mxu0 %v1045_v63  ;;  %2323 = vmatpush3.xpose.msra.mxu1 %v3315_v34 }
 0x22a   : > { %2293 = vmatprep.subr.mxu0 %v2700_v30  ;;  %2324 = vmatprep.subr.mxu1 %v2700_v30 }
 0x22b   : > { %2354 = vmatprep.mubr.msk.f32.mxu1 %vm2701_vm1, %v2700_v30 }
 0x22d   : > { %2294 = vmatpush3.xpose.msra.mxu0 %v1052_v32  ;;  %2325 = vmatpush3.xpose.msra.mxu1 %v3317_v35 }
 0x22e   : > { %2295 = vmatprep.subr.mxu0 %v2700_v30  ;;  %2326 = vmatprep.subr.mxu1 %v2700_v30 }
 0x231   : > { %2296 = vmatpush3.xpose.msra.mxu0 %v1059_v52  ;;  %2327 = vmatpush3.xpose.msra.mxu1 %v3320_v40 }
 0x232   : > { %2297 = vmatprep.subr.mxu0 %v2700_v30  ;;  %2328 = vmatprep.subr.mxu1 %v2700_v30 }
 0x235   : > { %2298 = vmatpush3.xpose.msra.mxu0 %v1066_v1  ;;  %2329 = vmatpush3.xpose.msra.mxu1 %v3331_v46 }
 0x236   : > { %2299 = vmatprep.subr.mxu0 %v2700_v30  ;;  %2330 = vmatprep.subr.mxu1 %v2700_v30 }
 0x239   : > { %2300 = vmatpush3.xpose.msra.mxu0 %v1073_v39  ;;  %2331 = vmatpush3.xpose.msra.mxu1 %v3343_v59 }
 0x23a   : > { %2301 = vmatprep.subr.mxu0 %v2700_v30  ;;  %2332 = vmatprep.subr.mxu1 %v2700_v30 }
 0x23d   : > { %2302 = vmatpush3.xpose.msra.mxu0 %v1080_v6  ;;  %2333 = vmatpush3.xpose.msra.mxu1 %v3358_v19 }
 0x23e   : > { %2303 = vmatprep.subr.mxu0 %v2700_v30  ;;  %2334 = vmatprep.subr.mxu1 %v2700_v30 }
 0x241   : > { %2304 = vmatpush3.xpose.msra.mxu0 %v1087_v17  ;;  %2335 = vmatpush3.xpose.msra.mxu1 %v3371_v42 }
 0x242   : > { %2305 = vmatprep.subr.mxu0 %v2700_v30  ;;  %2336 = vmatprep.subr.mxu1 %v2700_v30 }
 0x245   : > { %2306 = vmatpush3.xpose.msra.mxu0 %v1094_v24  ;;  %2337 = vmatpush3.xpose.msra.mxu1 %v3384_v58 }
 0x246   : > { %2307 = vmatprep.subr.mxu0 %v2700_v30  ;;  %2338 = vmatprep.subr.mxu1 %v2700_v30 }
 0x249   : > { %2308 = vmatpush3.xpose.msra.mxu0 %v1101_v43  ;;  %2339 = vmatpush3.xpose.msra.mxu1 %v3397_v14 }
 0x24a   : > { %2309 = vmatprep.subr.mxu0 %v2700_v30  ;;  %2340 = vmatprep.subr.mxu1 %v2700_v30 }
 0x24d   : > { %2310 = vmatpush3.xpose.msra.mxu0 %v1108_v26  ;;  %2341 = vmatpush3.xpose.msra.mxu1 %v3410_v51 }
 0x24e   : > { %2311 = vmatprep.subr.mxu0 %v2700_v30  ;;  %2342 = vmatprep.subr.mxu1 %v2700_v30 }
 0x251   : > { %2312 = vmatpush3.xpose.msra.mxu0 %v1115_v7  ;;  %2343 = vmatpush3.xpose.msra.mxu1 %v3423_v12 }
 0x252   : > { %2313 = vmatprep.subr.mxu0 %v2700_v30  ;;  %2344 = vmatprep.subr.mxu1 %v2700_v30 }
 0x255   : > { %2314 = vmatpush3.xpose.msra.mxu0 %v1122_v15  ;;  %2345 = vmatpush3.xpose.msra.mxu1 %v3436_v21 }
 0x256   : > { %2315 = vmatprep.subr.mxu0 %v2700_v30  ;;  %2346 = vmatprep.subr.mxu1 %v2700_v30 }
 0x259   : > { %2316 = vmatpush3.xpose.msra.mxu0 %v1129_v3  ;;  %2347 = vmatpush3.xpose.msra.mxu1 %v3449_v27 }
 0x25a   : > { %2317 = vmatprep.subr.mxu0 %v2700_v30  ;;  %2348 = vmatprep.subr.mxu1 %v2700_v30 }
 0x25d   : > { %2318 = vmatpush3.xpose.msra.mxu0 %v1136_v13  ;;  %2349 = vmatpush3.xpose.msra.mxu1 %v3462_v62 }
 0x25e   : > { %2350 = vmatprep.subr.mxu1 %v2700_v30 }
 0x260   : > { %2320 = vmatmul.mubr.f32.vlgmr.msra.gmra.mxu0 %v3477_v54 }
 0x261   : > { %2351 = vmatpush3.xpose.msra.mxu1 %v3475_v49 }
 0x262   : > { %2352 = vmatprep.subr.mxu1 %v2700_v30 }
 0x265   : > { %2353 = vmatpush3.xpose.msra.mxu1 %v3490_v41 }
 0x268   : > { %2355 = vmatmul.mubr.f32.vlgmr.msra.gmra.mxu1 %v3477_v54 }
 0x2a0   : > { %v1024_v34 = vpop.f32.mrf.mxu0 }
 0x2a2   : > { %v2181_v35 = vpop.f32.mrf.mxu0 }
 0x2a8   : > { %v1175_v40 = vpop.f32.mrf.mxu1 }
 0x2a9   : > { %v1176_v45 = vadd.f32 %v1175_v40, %v1024_v34 }
 0x2aa   : > { %v2216_v46 = vpop.f32.mrf.mxu1 }
 0x2e0   : > { %v1279_v47 = vpop.f32.mrf.mxu0 }
 0x2e1   : > { %v1280_v53 = vadd.f32 %v1279_v47, %v1176_v45 }
 0x2e2   : > { %v2251_v55 = vpop.f32.mrf.mxu0 }
 0x2e8   : > { %v1368_v57 = vpop.f32.mrf.mxu1 }
 0x2e9   : > { %v1369_v8 = vadd.f32 %v1368_v57, %v1280_v53 }
 0x2ea   : > { %v2286_v59 = vpop.f32.mrf.mxu1 }
 0x320   : > { %v1487_v63 = vpop.f32.mrf.mxu0 }
 0x321   : > { %v1488_v19 = vadd.f32 %v1487_v63, %v1369_v8 }
 0x322   : > { %v2321_v30 = vpop.f32.mrf.mxu0 }
 0x328   : > { %v1574_v32 = vpop.f32.mrf.mxu1 }
 0x329   : > { %v1575_v38 = vadd.f32 %v1574_v32, %v1488_v19 }
 0x32a   : > { %v2356_v42 = vpop.f32.mrf.mxu1 }
 0x32b   : > { %1578 = vst [vmem:[%s2943_s29] sm:$0xff] %v1575_v38 }
 0x32c   : > { %2576 = shalt.err (!%p2573_p3)
}
 0x32d   : > { %s2577_s26 = scalar_lea.hbm %s3696_s28, 128  ;;  %s2581_s14 = scalar_lea.hbm %s3801_s25, 1024 }
 0x32e   : > { %p2578_p10 = scmp.ne.s32.totalorder %s3696_s28, %s2577_s26  ;;  %p2582_p13 = scmp.lt.s32.totalorder %s3696_s28, %s3801_s25 }
 0x32f   : > { %p2583_p1 = scmp.lt.s32.totalorder %s2581_s14, %s2577_s26 }
 0x330   : > { %p2579_p6 = pnand %p2578_p10, %p3802_p5 }
 0x331   : > { %p2584_p2 = por %p2583_p1, %p2582_p13 }
 0x332   : > { %p2580_p11 = pneg %p2579_p6 }
 0x334   : > { %p2585_p7 = pnand %p2584_p2, %p2580_p11 }
 0x336   : > { %2588 = shalt.err (!%p2585_p7)
}
 0x337   : > { %2365 = dma.vmem_to_hbm [thread:$0]  (%p3802_p5), %s1596_s23, 128, %s3696_s28, %s1580_s15  }
 0x338 PF: > { %s3803_s3 = sld [smem:[#allocation18_spill]] }
 0x339   : > { %s3804_s0 = sld [smem:[#allocation14_spill]] }
 0x33a   : > { %s3805_s22 = sld [smem:[#allocation23_spill]] }
 0x33e   : > { %p2385_p0 = scmp.ge.s32.totalorder %s3803_s3, 2 }
 0x33f   : > { %s1607_s7 = sand.u32 1, %s3804_s0  }
 0x340   : > { %p3806_p8 = scmp.ne.s32.totalorder %s3805_s22, 0  ;;  %s1608_s8 = scalar_lea.sflag [#allocation5], %s1607_s7 }
 0x342   : > { %p2379_p12 = pnand %p2385_p0, %p3806_p8 }
 0x344   : > { %p2380_p4 = pneg %p2379_p12 }
 0x346   : > { %2646 = dma.done.wait (%p2380_p4), %s1608_s8, 128  }
 0x347   : > { %2648 = vsyncadd (%p2380_p4), %s1608_s8, 4294967168  ;;  %s20_s22 = sadd.s32 1, %s3803_s3   ;;  %s3807_s29 = sld [smem:[#allocation15_spill]] }
 0x348   : > { %p17_p9 = scmp.ge.s32.totalorder %s20_s22, 10   ;;  %s3808_s14 = sld [smem:[#allocation22_spill]] }
 0x349   : > { %s3809_s10 = sld [smem:[#allocation16_spill]]  ;;  %s3814_s12 = smov %s2655_s13 }
 0x34a   : > { %s3810_s17 = sld [smem:[#allocation21_spill]]  ;;  %s3816_s15 = smov %s2667_s16 }
 0x34b   : > { %s3811_s18 = sld [smem:[#allocation17_spill]]  ;;  %s3818_s19 = smov %s2687_s21 }
 0x34c   : > { %s3812_s20 = sld [smem:[#allocation19_spill]] }
 0x34d   : > { %s3813_s5 = sld [smem:[#allocation20_spill]]  ;;  %s3815_s13 = smov %s3807_s29 }
 0x34f   : > { %s3817_s16 = smov %s3809_s10  ;;  %19 = sbr.rel (!%p17_p9) target bundleno = 13 (0xd), region = 96 }
 0x353   : > { %s3819_s21 = smov %s3813_s5 }
 0x354   :  { %1613 = vsyncpa [#allocation4], 1 }
 0x355   :  { %1615 = vsyncpa [#allocation4 + $0x1], 1 }
 0x356   :  { %1616 = vsyncpa [#allocation7], 1 }
 0x357   :  { %1617 = vsyncpa [#allocation5], 1 }
 0x358   :  { %1619 = vsyncpa [#allocation5 + $0x1], 1 }

</bundles_post_ra>
